<compile_context>
chip_gen: v7x
topology: tpu7x:2x2x1
jax: 0.10.0
libtpu: 0.0.40
codegen_flags: <defaults>
</compile_context>

<pallas_src>
import jax
import jax.numpy as jnp
from jax.experimental import pallas as pl
from jax.experimental.pallas import tpu as pltpu


def _round_up(n, m):
    return ((n + m - 1) // m) * m


def _full_connect_kernel(x_ref, w1_ref, b1_ref, w2_ref, b2_ref, w3_ref, b3_ref,
                         o_ref):
    # x tile arrives as f32 (no wrapper pre-pass); cast to bf16 in-kernel so
    # the MXU runs bf16 x bf16 with f32 accumulation.
    x = x_ref[...].astype(jnp.bfloat16)

    # Linear(in -> 128) + ReLU.
    h1 = jnp.dot(x, w1_ref[...], preferred_element_type=jnp.float32) + b1_ref[...]
    h1 = jnp.maximum(h1, 0.0)
    # Dropout(p=0.5): identity at inference.

    # Linear(128 -> 32) + ReLU.  Tiny matmul, hidden behind the x DMA.
    h2 = jnp.dot(h1.astype(jnp.bfloat16), w2_ref[...],
                 preferred_element_type=jnp.float32) + b2_ref[...]
    h2 = jnp.maximum(h2, 0.0)
    # Dropout(p=0.5): identity at inference.

    # Linear(32 -> out_pad) + Sigmoid, written as a lane-dense bf16 slab.
    logits = jnp.dot(h2.astype(jnp.bfloat16), w3_ref[...],
                     preferred_element_type=jnp.float32) + b3_ref[...]
    # Sigmoid via EUP exp + approx reciprocal (keeps the VALU slot free).
    sig = pl.reciprocal(1.0 + jnp.exp(-logits), approx=True)
    o_ref[...] = sig.astype(o_ref.dtype)


def full_connect_forward(x, params, tb=1024):
    """x: (B, ...) — flattened to (B, input_dim) like x.view(x.size(0), -1)."""
    B = x.shape[0]
    x2d = x.reshape(B, -1)
    w1, b1, w2, b2, w3, b3 = params
    in_dim = w1.shape[0]
    out_dim = w3.shape[1]
    assert x2d.shape[1] == in_dim

    # Pad batch only to sublane granularity (16 rows covers f32 and bf16
    # blocks); at most 15 junk rows, and no copy at all when B % 16 == 0.
    B_pad = _round_up(B, 16)
    if B_pad != B:
        x2d = jnp.pad(x2d, ((0, B_pad - B), (0, 0)))

    # Batch tile: multiple of 16, capped at tb; for batches >= 256 rows keep at
    # least 2 grid steps so the "parallel" axis can use both v7x TensorCores.
    TB = min(_round_up(tb, 16), B_pad)
    if B_pad >= 256:
        TB = min(TB, _round_up((B_pad + 1) // 2, 16))
    grid = (B_pad + TB - 1) // TB  # ragged last tile handled by Pallas masking

    # Lane-dense output: pad out_dim to 128 lanes -> unmasked stores; bf16
    # output halves the slab's HBM write (wrapper upcasts after slicing).
    out_pad = _round_up(out_dim, 128)

    # Weights are tiny; cast to bf16 once in the wrapper.  Biases stay f32 and
    # all elementwise math runs in f32 (MXU accumulates in f32 regardless).
    w1b = w1.astype(jnp.bfloat16)
    w2b = w2.astype(jnp.bfloat16)
    w3b = jnp.zeros((w3.shape[0], out_pad), jnp.bfloat16).at[:, :out_dim].set(
        w3.astype(jnp.bfloat16))
    b1f = b1.reshape(1, -1).astype(jnp.float32)
    b2f = b2.reshape(1, -1).astype(jnp.float32)
    b3f = jnp.zeros((1, out_pad), jnp.float32).at[:, :out_dim].set(
        b3.reshape(1, -1).astype(jnp.float32))

    # Weights/biases: constant block index -> stay VMEM-resident, no re-DMA.
    def const(shape):
        return pl.BlockSpec(shape, lambda i, _n=len(shape): (0,) * _n)

    out = pl.pallas_call(
        _full_connect_kernel,
        out_shape=jax.ShapeDtypeStruct((B_pad, out_pad), jnp.bfloat16),
        grid=(grid,),
        in_specs=[
            pl.BlockSpec((TB, in_dim), lambda i: (i, 0)),
            const(w1b.shape), const(b1f.shape),
            const(w2b.shape), const(b2f.shape),
            const(w3b.shape), const(b3f.shape),
        ],
        out_specs=pl.BlockSpec((TB, out_pad), lambda i: (i, 0)),
        compiler_params=pltpu.CompilerParams(
            dimension_semantics=("parallel",)),
    )(x2d, w1b, b1f, w2b, b2f, w3b, b3f)

    return out[:B, :out_dim].astype(jnp.float32)


def init_params(key, input_dim=512, output_dim=2):
    """Deterministic init. Weights stored as (in, out) == torch W.T, f32."""
    dims = [(input_dim, 128), (128, 32), (32, output_dim)]
    params = []
    for i, (fan_in, fan_out) in enumerate(dims):
        kw, kb = jax.random.split(jax.random.fold_in(key, i))
        bound = 1.0 / (fan_in ** 0.5)  # matches nn.Linear default init range
        w = jax.random.uniform(kw, (fan_in, fan_out), jnp.float32, -bound, bound)
        b = jax.random.uniform(kb, (1, fan_out), jnp.float32, -bound, bound)
        params += [w, b]
    return tuple(params)


if __name__ == "__main__":
    key = jax.random.PRNGKey(0)
    kx, kp = jax.random.split(key)

    B, input_dim, output_dim = 8, 512, 2
    x = jax.random.normal(kx, (B, input_dim), jnp.float32)
    params = init_params(kp, input_dim, output_dim)

    out = full_connect_forward(x, params)
    out = jax.block_until_ready(out)

    # Reference check in plain f32 JAX (same math, eval-mode dropout).
    # bf16 weights/activations + bf16 output + approx reciprocal in the kernel
    # -> loosened tolerance vs the f32 reference.
    w1, b1, w2, b2, w3, b3 = params
    h = jnp.maximum(x @ w1 + b1, 0.0)
    h = jnp.maximum(h @ w2 + b2, 0.0)
    ref = jax.nn.sigmoid(h @ w3 + b3)

    assert out.shape == (B, output_dim)
    assert jnp.allclose(out, ref, atol=2e-2, rtol=2e-2), (
        f"max abs err {jnp.max(jnp.abs(out - ref))}")

    print("KERNEL_OK")
</pallas_src>

<mosaic_0001>
module attributes {stable_mosaic.version = 11 : i64} {
  func.func @_full_connect_kernel(%arg0: i32, %arg1: memref<16x512xf32, #tpu.memory_space<vmem>>, %arg2: memref<512x128xbf16, #tpu.memory_space<vmem>>, %arg3: memref<1x128xf32, #tpu.memory_space<vmem>>, %arg4: memref<128x32xbf16, #tpu.memory_space<vmem>>, %arg5: memref<1x32xf32, #tpu.memory_space<vmem>>, %arg6: memref<32x128xbf16, #tpu.memory_space<vmem>>, %arg7: memref<1x128xf32, #tpu.memory_space<vmem>>, %arg8: memref<16x128xbf16, #tpu.memory_space<vmem>>) attributes {dimension_semantics = [#tpu.dimension_semantics<parallel>], iteration_bounds = array<i64: 1>, scalar_prefetch = 0 : i64, scratch_operands = 0 : i64, tpu.core_type = #tpu.core_type<tc>, window_params = [{transform_indices = @transform_0, window_bounds = array<i64: 16, 512>}, {pipeline_mode = #tpu.pipeline_mode<synchronous>, transform_indices = @transform_1, window_bounds = array<i64: 512, 128>}, {pipeline_mode = #tpu.pipeline_mode<synchronous>, transform_indices = @transform_2, window_bounds = array<i64: 1, 128>}, {pipeline_mode = #tpu.pipeline_mode<synchronous>, transform_indices = @transform_3, window_bounds = array<i64: 128, 32>}, {pipeline_mode = #tpu.pipeline_mode<synchronous>, transform_indices = @transform_4, window_bounds = array<i64: 1, 32>}, {pipeline_mode = #tpu.pipeline_mode<synchronous>, transform_indices = @transform_5, window_bounds = array<i64: 32, 128>}, {pipeline_mode = #tpu.pipeline_mode<synchronous>, transform_indices = @transform_6, window_bounds = array<i64: 1, 128>}, {transform_indices = @transform_7, window_bounds = array<i64: 16, 128>}]} {
    %c0 = arith.constant 0 : index
    %c0_0 = arith.constant 0 : index
    %0 = vector.load %arg1[%c0, %c0_0] : memref<16x512xf32, #tpu.memory_space<vmem>>, vector<16x512xf32>
    %1 = arith.truncf %0 : vector<16x512xf32> to vector<16x512xbf16>
    %c0_1 = arith.constant 0 : index
    %c0_2 = arith.constant 0 : index
    %2 = vector.load %arg2[%c0_1, %c0_2] : memref<512x128xbf16, #tpu.memory_space<vmem>>, vector<512x128xbf16>
    %cst = arith.constant dense<0.000000e+00> : vector<16x128xf32>
    %3 = tpu.matmul %1, %2, %cst {dimension_numbers = #tpu.dot_dimension_numbers<[1], [0], [0], [1], [0, 0, 1, 1], [], []>} : vector<16x512xbf16>, vector<512x128xbf16>, vector<16x128xf32> -> vector<16x128xf32>
    %c0_3 = arith.constant 0 : index
    %c0_4 = arith.constant 0 : index
    %4 = vector.load %arg3[%c0_3, %c0_4] : memref<1x128xf32, #tpu.memory_space<vmem>>, vector<1x128xf32>
    %5 = vector.broadcast %4 : vector<1x128xf32> to vector<16x128xf32>
    %6 = arith.addf %3, %5 : vector<16x128xf32>
    %cst_5 = arith.constant 0.000000e+00 : f32
    %7 = vector.broadcast %cst_5 : f32 to vector<16x128xf32>
    %8 = arith.maximumf %6, %7 : vector<16x128xf32>
    %9 = arith.truncf %8 : vector<16x128xf32> to vector<16x128xbf16>
    %c0_6 = arith.constant 0 : index
    %c0_7 = arith.constant 0 : index
    %10 = vector.load %arg4[%c0_6, %c0_7] : memref<128x32xbf16, #tpu.memory_space<vmem>>, vector<128x32xbf16>
    %cst_8 = arith.constant dense<0.000000e+00> : vector<16x32xf32>
    %11 = tpu.matmul %9, %10, %cst_8 {dimension_numbers = #tpu.dot_dimension_numbers<[1], [0], [0], [1], [0, 0, 1, 1], [], []>} : vector<16x128xbf16>, vector<128x32xbf16>, vector<16x32xf32> -> vector<16x32xf32>
    %c0_9 = arith.constant 0 : index
    %c0_10 = arith.constant 0 : index
    %12 = vector.load %arg5[%c0_9, %c0_10] : memref<1x32xf32, #tpu.memory_space<vmem>>, vector<1x32xf32>
    %13 = vector.broadcast %12 : vector<1x32xf32> to vector<16x32xf32>
    %14 = arith.addf %11, %13 : vector<16x32xf32>
    %cst_11 = arith.constant 0.000000e+00 : f32
    %15 = vector.broadcast %cst_11 : f32 to vector<16x32xf32>
    %16 = arith.maximumf %14, %15 : vector<16x32xf32>
    %17 = arith.truncf %16 : vector<16x32xf32> to vector<16x32xbf16>
    %c0_12 = arith.constant 0 : index
    %c0_13 = arith.constant 0 : index
    %18 = vector.load %arg6[%c0_12, %c0_13] : memref<32x128xbf16, #tpu.memory_space<vmem>>, vector<32x128xbf16>
    %cst_14 = arith.constant dense<0.000000e+00> : vector<16x128xf32>
    %19 = tpu.matmul %17, %18, %cst_14 {dimension_numbers = #tpu.dot_dimension_numbers<[1], [0], [0], [1], [0, 0, 1, 1], [], []>} : vector<16x32xbf16>, vector<32x128xbf16>, vector<16x128xf32> -> vector<16x128xf32>
    %c0_15 = arith.constant 0 : index
    %c0_16 = arith.constant 0 : index
    %20 = vector.load %arg7[%c0_15, %c0_16] : memref<1x128xf32, #tpu.memory_space<vmem>>, vector<1x128xf32>
    %21 = vector.broadcast %20 : vector<1x128xf32> to vector<16x128xf32>
    %22 = arith.addf %19, %21 : vector<16x128xf32>
    %cst_17 = arith.constant 0.000000e+00 : f32
    %23 = vector.broadcast %cst_17 : f32 to vector<16x128xf32>
    %24 = arith.subf %23, %22 : vector<16x128xf32>
    %25 = math.exp %24 : vector<16x128xf32>
    %cst_18 = arith.constant 1.000000e+00 : f32
    %26 = vector.broadcast %cst_18 : f32 to vector<16x128xf32>
    %27 = arith.addf %26, %25 : vector<16x128xf32>
    %28 = tpu.reciprocal %27 {approx = true} : vector<16x128xf32> -> vector<16x128xf32>
    %29 = arith.truncf %28 : vector<16x128xf32> to vector<16x128xbf16>
    %c0_19 = arith.constant 0 : index
    %c0_20 = arith.constant 0 : index
    %30 = vector.load %arg8[%c0_19, %c0_20] : memref<16x128xbf16, #tpu.memory_space<vmem>>, vector<16x128xbf16>
    tpu.vector_store %arg8[%c0_19, %c0_20], %29 {strides = array<i32>} : memref<16x128xbf16, #tpu.memory_space<vmem>>, vector<16x128xbf16>,
    return
  }
  func.func @transform_0(%arg0: i32) -> (i32, i32) {
    %c0_i32 = arith.constant 0 : i32
    %c0_i32_0 = arith.constant 0 : i32
    return %arg0, %c0_i32 : i32, i32
  }
  func.func @transform_1(%arg0: i32) -> (i32, i32) {
    %c0_i32 = arith.constant 0 : i32
    %c0_i32_0 = arith.constant 0 : i32
    %c0_i32_1 = arith.constant 0 : i32
    return %c0_i32, %c0_i32_0 : i32, i32
  }
  func.func @transform_2(%arg0: i32) -> (i32, i32) {
    %c0_i32 = arith.constant 0 : i32
    %c0_i32_0 = arith.constant 0 : i32
    %c0_i32_1 = arith.constant 0 : i32
    return %c0_i32, %c0_i32_0 : i32, i32
  }
  func.func @transform_3(%arg0: i32) -> (i32, i32) {
    %c0_i32 = arith.constant 0 : i32
    %c0_i32_0 = arith.constant 0 : i32
    %c0_i32_1 = arith.constant 0 : i32
    return %c0_i32, %c0_i32_0 : i32, i32
  }
  func.func @transform_4(%arg0: i32) -> (i32, i32) {
    %c0_i32 = arith.constant 0 : i32
    %c0_i32_0 = arith.constant 0 : i32
    %c0_i32_1 = arith.constant 0 : i32
    return %c0_i32, %c0_i32_0 : i32, i32
  }
  func.func @transform_5(%arg0: i32) -> (i32, i32) {
    %c0_i32 = arith.constant 0 : i32
    %c0_i32_0 = arith.constant 0 : i32
    %c0_i32_1 = arith.constant 0 : i32
    return %c0_i32, %c0_i32_0 : i32, i32
  }
  func.func @transform_6(%arg0: i32) -> (i32, i32) {
    %c0_i32 = arith.constant 0 : i32
    %c0_i32_0 = arith.constant 0 : i32
    %c0_i32_1 = arith.constant 0 : i32
    return %c0_i32, %c0_i32_0 : i32, i32
  }
  func.func @transform_7(%arg0: i32) -> (i32, i32) {
    %c0_i32 = arith.constant 0 : i32
    %c0_i32_0 = arith.constant 0 : i32
    return %arg0, %c0_i32 : i32, i32
  }
}

</mosaic_0001>

<bundles_post_ra>
// kernel: tpu_custom_call.1
= control target key start
LH: loop header
LB: loop body
LE: loop exit
PB: predicated region body
PF: predicated region fallthrough
CT: control target
= control target key end

     0   :  { %12 = vsyncpa [#allocation3], 0  ;;  %s1004_s0 = inlined_call_operand.vmem [shape: f32[16,512], index: 0, kind: input, shape index: {}]   ;;  %s1005_s1 = inlined_call_operand.hbm [shape: bf16[512,128], index: 1, kind: input, shape index: {}]   ;;  %s1006_s2 = inlined_call_operand.vmem [shape: f32[1,128], index: 2, kind: input, shape index: {}]   ;;  %s1007_s3 = inlined_call_operand.vmem [shape: bf16[128,32], index: 3, kind: input, shape index: {}]   ;;  %s1008_s4 = inlined_call_operand.vmem [shape: f32[1,32], index: 4, kind: input, shape index: {}]   ;;  %s1009_s5 = inlined_call_operand.vmem [shape: bf16[32,128], index: 5, kind: input, shape index: {}]   ;;  %s1010_s6 = inlined_call_operand.vmem [shape: f32[1,128], index: 6, kind: input, shape index: {}]   ;;  %s1011_s7 = inlined_call_operand.hbm [shape: bf16[16,128], index: 7, kind: output, shape index: {}]  }
   0x1   :  { %13 = vsyncpa [#allocation4], 0  ;;  %s865_s24 = smov [#allocation2]   ;;  %s817_s28 = scalar_lea.hbm %s1005_s1, 4096 }
   0x2   :  { %s21_s25 = sshll.u32 %s865_s24, 4  ;;  %p818_p0 = scmp.ne.s32.totalorder %s1005_s1, %s817_s28  ;;  %s22_s25 = int_to_ptr.vmem [resolvable:$true] %s21_s25 }
   0x3   :  { %p821_p1 = scmp.lt.u32.totalorder %s817_s28, %s1005_s1 }
   0x5   :  { %p823_p2 = pnand %p821_p1, %p818_p0 }
   0x7   :  { %826 = shalt.err (!%p823_p2)
}
   0x8   :  { %s827_s10 = scalar_lea.vmem %s22_s25, 4096  ;;  %p832_p4 = scmp.lt.s32.totalorder %s22_s25, %s22_s25 }
   0x9   :  { %p828_p3 = scmp.ne.s32.totalorder %s22_s25, %s827_s10  ;;  %p833_p5 = scmp.lt.s32.totalorder %s827_s10, %s827_s10 }
   0xb   :  { %p834_p6 = por %p833_p5, %p832_p4 }
   0xd   :  { %p835_p7 = pnand %p834_p6, %p828_p3 }
   0xf   :  { %838 = shalt.err (!%p835_p7)
}
  0x10   :  { %s866_s11 = smov 64   ;;  %s867_s12 = smov 4  }
  0x11   :  { %27 = dma.hbm_to_vmem [thread:$0]  %s1005_s1, 4096, %s22_s25, [#allocation3], %s866_s11, %s866_s11, %s867_s12  }
  0x12   :  { %861 = dma.done.wait [#allocation3], 4096  }
  0x13   :  { %862 = vsyncadd [#allocation3], 4294963200  ;;  %v767_v0 = vld [vmem:[#allocation2 + $0x40] sm:$0xff]   ;;  %v771_v4 = vld [vmem:[#allocation2 + $0x48] sm:$0xff]   ;;  %v868_v39 = vmov 0.0   ;;  %vm869_vm0 = vmmov 0  }
  0x14   :  { %v768_v1 = vld [vmem:[#allocation2 + $0xc0] sm:$0xff]   ;;  %677 = vmatprep.subr.bf16.mxu0 %v767_v0  ;;  %v772_v5 = vld [vmem:[#allocation2 + $0xc8] sm:$0xff]   ;;  %v775_v8 = vld [vmem:[#allocation2 + $0x50] sm:$0xff]   ;;  %vm540_vm1 = vcmask 261120  }
  0x15   :  { %v769_v2 = vld [vmem:[#allocation2] sm:$0xff]   ;;  %699 = vmatprep.subr.bf16.mxu1 %v768_v1  ;;  %v773_v6 = vld [vmem:[#allocation2 + $0x8] sm:$0xff]   ;;  %v776_v9 = vld [vmem:[#allocation2 + $0xd0] sm:$0xff]  }
  0x16   :  { %v770_v3 = vld [vmem:[#allocation2 + $0x80] sm:$0xff]   ;;  %678 = vmatpush3.bf16.msra.mxu0 %v769_v2  ;;  %v774_v7 = vld [vmem:[#allocation2 + $0x88] sm:$0xff]   ;;  %v777_v10 = vld [vmem:[#allocation2 + $0x10] sm:$0xff]  }
  0x17   :  { %700 = vmatpush3.bf16.msra.mxu1 %v770_v3  ;;  %679 = vmatprep.subr.bf16.mxu0 %v771_v4  ;;  %v778_v11 = vld [vmem:[#allocation2 + $0x90] sm:$0xff]   ;;  %v779_v12 = vld [vmem:[#allocation2 + $0x58] sm:$0xff]   ;;  %v783_v16 = vld [vmem:[#allocation2 + $0x60] sm:$0xff]  }
  0x18   :  { %701 = vmatprep.subr.bf16.mxu1 %v772_v5  ;;  %v780_v13 = vld [vmem:[#allocation2 + $0xd8] sm:$0xff]   ;;  %v784_v17 = vld [vmem:[#allocation2 + $0xe0] sm:$0xff]   ;;  %v787_v20 = vld [vmem:[#allocation2 + $0x68] sm:$0xff]  }
  0x19   :  { %v781_v14 = vld [vmem:[#allocation2 + $0x18] sm:$0xff]   ;;  %v785_v18 = vld [vmem:[#allocation2 + $0x20] sm:$0xff]   ;;  %v788_v21 = vld [vmem:[#allocation2 + $0xe8] sm:$0xff]  }
  0x1a   :  { %680 = vmatpush3.bf16.msra.mxu0 %v773_v6  ;;  %v782_v15 = vld [vmem:[#allocation2 + $0x98] sm:$0xff]   ;;  %v786_v19 = vld [vmem:[#allocation2 + $0xa0] sm:$0xff]   ;;  %v789_v22 = vld [vmem:[#allocation2 + $0x28] sm:$0xff]  }
  0x1b   :  { %702 = vmatpush3.bf16.msra.mxu1 %v774_v7  ;;  %681 = vmatprep.subr.bf16.mxu0 %v775_v8  ;;  %v790_v23 = vld [vmem:[#allocation2 + $0xa8] sm:$0xff]   ;;  %v791_v24 = vld [vmem:[#allocation2 + $0x70] sm:$0xff]   ;;  %v795_v28 = vld [vmem:[#allocation2 + $0x78] sm:$0xff]  }
  0x1c   :  { %703 = vmatprep.subr.bf16.mxu1 %v776_v9  ;;  %v792_v25 = vld [vmem:[#allocation2 + $0xf0] sm:$0xff]   ;;  %v796_v29 = vld [vmem:[#allocation2 + $0xf8] sm:$0xff]   ;;  %v43_v32 = vld [vmem:[%s1004_s0 + $0x8] sm:$0xff] }
  0x1d   :  { %v793_v26 = vld [vmem:[#allocation2 + $0x30] sm:$0xff]   ;;  %v797_v30 = vld [vmem:[#allocation2 + $0x38] sm:$0xff]   ;;  %v47_v33 = vld [vmem:[%s1004_s0 + $0x28] sm:$0xff] }
  0x1e   :  { %682 = vmatpush3.bf16.msra.mxu0 %v777_v10  ;;  %v794_v27 = vld [vmem:[#allocation2 + $0xb0] sm:$0xff]   ;;  %v798_v31 = vld [vmem:[#allocation2 + $0xb8] sm:$0xff]   ;;  %v51_v35 = vpack.c.bf16 %v47_v33, %v43_v32  ;;  %v42_v37 = vld [vmem:[%s1004_s0] sm:$0xff] }
  0x1f   :  { %704 = vmatpush3.bf16.msra.mxu1 %v778_v11  ;;  %683 = vmatprep.subr.bf16.mxu0 %v779_v12  ;;  %v45_v34 = vld [vmem:[%s1004_s0 + $0x18] sm:$0xff]  ;;  %v46_v38 = vld [vmem:[%s1004_s0 + $0x20] sm:$0xff]  ;;  %v44_v42 = vld [vmem:[%s1004_s0 + $0x10] sm:$0xff] }
  0x20   :  { %705 = vmatprep.subr.bf16.mxu1 %v780_v13  ;;  %v49_v36 = vld [vmem:[%s1004_s0 + $0x38] sm:$0xff]  ;;  %v50_v41 = vpack.c.bf16 %v46_v38, %v42_v37  ;;  %v48_v43 = vld [vmem:[%s1004_s0 + $0x30] sm:$0xff]  ;;  %349 = vmatprep.mubr.bf16.mxu0 %v51_v35  ;;  %v799_v45 = vld [vmem:[%s1007_s3] sm:$0xff]  }
  0x21   :  { %v53_v40 = vpack.c.bf16 %v49_v36, %v45_v34  ;;  %v52_v44 = vpack.c.bf16 %v48_v43, %v44_v42  ;;  %v800_v46 = vld [vmem:[%s1007_s3 + $0x8] sm:$0xff]   ;;  %v801_v47 = vld [vmem:[%s1007_s3 + $0x10] sm:$0xff]   ;;  %v802_v48 = vld [vmem:[%s1007_s3 + $0x18] sm:$0xff]  }
  0x22   :  { %684 = vmatpush3.bf16.msra.mxu0 %v781_v14  ;;  %v803_v49 = vld [vmem:[%s1007_s3 + $0x20] sm:$0xff]   ;;  %v804_v50 = vld [vmem:[%s1007_s3 + $0x28] sm:$0xff]   ;;  %v805_v51 = vld [vmem:[%s1007_s3 + $0x30] sm:$0xff]  }
  0x23   :  { %706 = vmatpush3.bf16.msra.mxu1 %v782_v15  ;;  %685 = vmatprep.subr.bf16.mxu0 %v783_v16  ;;  %v806_v52 = vld [vmem:[%s1007_s3 + $0x38] sm:$0xff]   ;;  %v622_v55 = vld [vmem:[%s1006_s2] ss:$0 sm:$0xff]  ;;  %v808_v10 = vld [vmem:[%s1009_s5 + $0x8] sm:$0xff]  }
  0x24   :  { %707 = vmatprep.subr.bf16.mxu1 %v784_v17  ;;  %390 = vmatprep.mubr.bf16.mxu1 %v53_v40  ;;  %v807_v9 = vld [vmem:[%s1009_s5] sm:$0xff]  }
  0x25   :  { %v655_v11 = vld [vmem:[%s1008_s4] ss:$0 sm:$0xff]  ;;  %s870_s4 = smov [#allocation5]  }
  0x26   :  { %686 = vmatpush3.bf16.msra.mxu0 %v785_v18  ;;  %s610_s5 = sshll.u32 %s870_s4, 4  ;;  %s611_s5 = int_to_ptr.vmem [resolvable:$true] %s610_s5 }
  0x27   :  { %708 = vmatpush3.bf16.msra.mxu1 %v786_v19  ;;  %687 = vmatprep.subr.bf16.mxu0 %v787_v20  ;;  %p844_p9 = scmp.lt.s32.totalorder %s611_s5, %s611_s5 }
  0x28   :  { %709 = vmatprep.subr.bf16.mxu1 %v788_v21  ;;  %v664_v21 = vld [vmem:[%s1010_s6] ss:$0 sm:$0xff]  ;;  %s839_s6 = scalar_lea.vmem %s611_s5, 128 }
  0x29   :  { %p840_p8 = scmp.ne.s32.totalorder %s611_s5, %s839_s6  ;;  %p845_p10 = scmp.lt.s32.totalorder %s839_s6, %s839_s6 }
  0x2a   :  { %688 = vmatpush3.bf16.msra.mxu0 %v789_v22 }
  0x2b   :  { %710 = vmatpush3.bf16.msra.mxu1 %v790_v23  ;;  %689 = vmatprep.subr.bf16.mxu0 %v791_v24  ;;  %p846_p11 = por %p845_p10, %p844_p9 }
  0x2c   :  { %711 = vmatprep.subr.bf16.mxu1 %v792_v25 }
  0x2d   :  { %p847_p12 = pnand %p846_p11, %p840_p8 }
  0x2e   :  { %690 = vmatpush3.bf16.msra.mxu0 %v793_v26 }
  0x2f   :  { %712 = vmatpush3.bf16.msra.mxu1 %v794_v27  ;;  %691 = vmatprep.subr.bf16.mxu0 %v795_v28 }
  0x30   :  { %713 = vmatprep.subr.bf16.mxu1 %v796_v29 }
  0x32   :  { %692 = vmatpush3.bf16.msra.mxu0 %v797_v30 }
  0x33   :  { %714 = vmatpush3.bf16.msra.mxu1 %v798_v31  ;;  %733 = vmatprep.subr.bf16.mxu0 %v868_v39 }
  0x34   :  { %753 = vmatprep.subr.bf16.mxu1 %v868_v39 }
  0x35   :  { %350 = vmatmul.mubr.bf16.vlgmr.msra.gmra.mrb[0].mxu0 %v50_v41 }
  0x36   :  { %391 = vmatmul.mubr.bf16.vlgmr.msra.gmra.mrb[0].mxu1 %v52_v44  ;;  %734 = vmatpush3.bf16.msra.mxu0 %v799_v45 }
  0x37   :  { %735 = vmatprep.subr.bf16.mxu0 %v868_v39  ;;  %749 = vmatprep.mubr.msk.bf16.mxu0 %vm869_vm0, %v868_v39 }
  0x38   :  { %757 = vmatprep.mubr.msk.bf16.mxu1 %vm869_vm0, %v868_v39  ;;  %754 = vmatpush3.bf16.msra.mxu1 %v807_v9 }
  0x39   :  { %755 = vmatprep.subr.bf16.mxu1 %v868_v39 }
  0x3a   :  { %736 = vmatpush3.bf16.msra.mxu0 %v800_v46 }
  0x3b   :  { %737 = vmatprep.subr.bf16.mxu0 %v868_v39 }
  0x3c   :  { %756 = vmatpush3.bf16.msra.mxu1 %v808_v10 }
  0x3e   :  { %738 = vmatpush3.bf16.msra.mxu0 %v801_v47 }
  0x3f   :  { %739 = vmatprep.subr.bf16.mxu0 %v868_v39 }
  0x42   :  { %740 = vmatpush3.bf16.msra.mxu0 %v802_v48 }
  0x43   :  { %741 = vmatprep.subr.bf16.mxu0 %v868_v39 }
  0x46   :  { %742 = vmatpush3.bf16.msra.mxu0 %v803_v49 }
  0x47   :  { %743 = vmatprep.subr.bf16.mxu0 %v868_v39 }
  0x4a   :  { %744 = vmatpush3.bf16.msra.mxu0 %v804_v50 }
  0x4b   :  { %745 = vmatprep.subr.bf16.mxu0 %v868_v39 }
  0x4e   :  { %746 = vmatpush3.bf16.msra.mxu0 %v805_v51 }
  0x4f   :  { %747 = vmatprep.subr.bf16.mxu0 %v868_v39 }
  0x52   :  { %748 = vmatpush3.bf16.msra.mxu0 %v806_v52 }
 0x108   :  { %v693_v53 = vpop.f32.mrb[0].mxu0 }
 0x109   :  { %v715_v54 = vpop.f32.mrb[0].mxu1  ;;  %v694_v56 = vpop.f32.mrb[1].mxu0 }
 0x10a   :  { %v695_v57 = vadd.f32 %v694_v56, %v693_v53  ;;  %v716_v58 = vpop.f32.mrb[1].mxu1  ;;  %v696_v59 = vpop.f32.mrb[2].mxu0 }
 0x10b   :  { %v717_v60 = vadd.f32 %v716_v58, %v715_v54  ;;  %v718_v61 = vpop.f32.mrb[2].mxu1  ;;  %v697_v62 = vpop.f32.mrb[3].mxu0 }
 0x10c   :  { %v352_v63 = vadd.f32 %v695_v57, %v622_v55  ;;  %v698_v0 = vadd.f32 %v697_v62, %v696_v59  ;;  %v719_v1 = vpop.f32.mrb[3].mxu1 }
 0x10d   :  { %v720_v2 = vadd.f32 %v719_v1, %v718_v61 }
 0x10e   :  { %v393_v3 = vadd.f32 %v717_v60, %v352_v63  ;;  %v355_v4 = vadd.f32 %v698_v0, %v622_v55 }
 0x110   :  { %v396_v5 = vadd.f32 %v720_v2, %v355_v4  ;;  %v399_v6 = vmax.f32 %v393_v3, 0.0 }
 0x112   :  { %v400_v7 = vmax.f32 %v396_v5, 0.0 }
 0x114   :  { %v401_v8 = vpack.c.bf16 %v400_v7, %v399_v6 }
 0x116   :  { %750 = vmatmul.mubr.bf16.vlgmr.msra.gmra.mrb[4].mxu0 %v401_v8 }
 0x1e9   :  { %v507_v12 = vpop.f32.mrb[4].mxu0 }
 0x1ea   :  { %v508_v13 = vadd.f32 %v655_v11, %v507_v12  ;;  %v751_v14 = vpop.f32.mrb[5].mxu0 }
 0x1eb   :  { %v510_v15 = vpop.f32.mrb[6].mxu0 }
 0x1ec   :  { %v511_v16 = vadd.f32 %v655_v11, %v510_v15  ;;  %v752_v17 = vpop.f32.mrb[7].mxu0  ;;  %v514_v18 = vmax.f32 %v508_v13, 0.0 }
 0x1ee   :  { %v515_v19 = vmax.f32 %v511_v16, 0.0 }
 0x1f0   :  { %v516_v20 = vpack.c.bf16 %v515_v19, %v514_v18 }
 0x1f2   :  { %758 = vmatmul.mubr.msk.bf16.vlgmr.msra.gmra.mrb[4].mxu1 %vm540_vm1, %v516_v20 }
 0x2c5   :  { %v578_v22 = vpop.f32.mrb[4].mxu1 }
 0x2c6   :  { %v579_v23 = vadd.f32 %v664_v21, %v578_v22  ;;  %v759_v24 = vpop.f32.mrb[5].mxu1 }
 0x2c7   :  { %v581_v25 = vpop.f32.mrb[6].mxu1 }
 0x2c8   :  { %v585_v26 = vsub.f32 0.0, %v579_v23  ;;  %v582_v27 = vadd.f32 %v664_v21, %v581_v25  ;;  %v760_v28 = vpop.f32.mrb[7].mxu1 }
 0x2ca   :  { %v587_v29 = vmul.f32 1.442695, %v585_v26  ;;  %v586_v30 = vsub.f32 0.0, %v582_v27 }
 0x2cc   :  { %809 = vpow2.f32 %v587_v29  ;;  %v589_v31 = vmul.f32 1.442695, %v586_v30 }
 0x2ce   :  { %811 = vpow2.f32 %v589_v31 }
 0x2d6   :  { %v810_v32 = vpop.eup %809 }
 0x2d7   :  { %v591_v33 = vadd.f32 1.0, %v810_v32 }
 0x2d8   :  { %v812_v34 = vpop.eup %811 }
 0x2d9   :  { %v592_v35 = vadd.f32 1.0, %v812_v34  ;;  %813 = vrcp.f32 %v591_v33 }
 0x2db   :  { %815 = vrcp.f32 %v592_v35 }
 0x2e3   :  { %v814_v36 = vpop.eup %813 }
 0x2e5   :  { %v816_v37 = vpop.eup %815 }
 0x2e6   :  { %v675_v38 = vpack.c.bf16 %v816_v37, %v814_v36 }
 0x2e8   :  { %676 = vst [vmem:[#allocation5] sm:$0xff] %v675_v38  }
 0x2e9   :  { %850 = shalt.err (!%p847_p12)
}
 0x2ea   :  { %s851_s10 = scalar_lea.hbm %s1011_s7, 128 }
 0x2eb   :  { %p852_p13 = scmp.ne.s32.totalorder %s1011_s7, %s851_s10  ;;  %p855_p0 = scmp.lt.u32.totalorder %s851_s10, %s1011_s7 }
 0x2ed   :  { %p857_p1 = pnand %p855_p0, %p852_p13 }
 0x2ef   :  { %860 = shalt.err (!%p857_p1)
}
 0x2f0   :  { %616 = dma.vmem_to_hbm [thread:$0]  %s611_s5, 128, %s1011_s7, [#allocation4], %s866_s11, %s866_s11, %s867_s12  }
 0x2f1   :  { %863 = dma.done.wait [#allocation4], 128  }
 0x2f2   :  { %864 = vsyncadd [#allocation4], 4294967168 }
 0x2f3   :  { %620 = vsyncpa [#allocation3], 1 }
 0x2f4   :  { %621 = vsyncpa [#allocation4], 1 }

</bundles_post_ra>
